<compile_context>
chip_gen: v7x
topology: tpu7x:2x2x1
jax: 0.10.0
libtpu: 0.0.40
codegen_flags: <defaults>
</compile_context>

<pallas_src>
import jax
import jax.numpy as jnp
from jax import lax
from jax.experimental import pallas as pl
from jax.experimental.pallas import tpu as pltpu

EPS = 1e-8    # RMSNorm eps (matches torch default in the module)
NEG = -10000.0


def _make_kernel(L, H, QKV, NH, DH, with_scores):
    def kernel(x_ref, mask_ref, scale_ref, wqkv_ref, wout_ref, bias_ref,
               out_ref, *rest):
        if with_scores:
            scores_ref, k_ref, v_ref, ctx_ref = rest
        else:
            k_ref, v_ref, ctx_ref = rest

        x = x_ref[0]                                           # (L, H) f32

        # ---- RMSNorm (p = -1, no bias): x / (||x||/sqrt(H) + eps) * scale ----
        norm = jnp.sqrt(jnp.sum(x * x, axis=-1, keepdims=True))
        rms = norm * (float(H) ** -0.5)
        inv_rms = pl.reciprocal(rms + EPS, approx=True)        # EUP slot
        xn = x * inv_rms * scale_ref[...]                      # (L, H) f32

        # ---- fused QKV projection (bf16 MXU operands, f32 accumulate) ----
        qkv = jnp.dot(xn.astype(jnp.bfloat16), wqkv_ref[...],
                      preferred_element_type=jnp.float32)      # (L, 3*QKV) f32

        # lane-dense K / V outputs (bf16, one full-width store each); the
        # (B, NH, L, DH) head view is produced by the wrapper.
        k_ref[0] = qkv[:, QKV:2 * QKV].astype(jnp.bfloat16)
        v_ref[0] = qkv[:, 2 * QKV:3 * QKV].astype(jnp.bfloat16)

        qkv_b = qkv.astype(jnp.bfloat16)                       # MXU operands

        # per-batch padding mask (keys dimension); causal + positional bias are
        # already folded into the precomputed, VMEM-resident bias_ref.
        pad_add = (1.0 - mask_ref[0]) * NEG                    # (1, L) f32

        # ---- per-head attention; PV results packed into (L, QKV) scratch ----
        # NOTE: at larger NH convert this static loop to lax.fori_loop (or a
        # head grid axis) to bound vreg live ranges; at realistic DH relayout
        # qkv head-major once instead of lane sub-slicing per head.
        for h in range(NH):
            qh = qkv_b[:, h * DH:(h + 1) * DH]                 # (L, DH) bf16
            kh = qkv_b[:, QKV + h * DH:QKV + (h + 1) * DH]
            vh = qkv_b[:, 2 * QKV + h * DH:2 * QKV + (h + 1) * DH]

            # q @ k^T (NO 1/sqrt(d) scaling — matches the module)
            s = lax.dot_general(qh, kh, (((1,), (1,)), ((), ())),
                                preferred_element_type=jnp.float32)  # (L, L) f32

            # + relative-position bias + causal (precomputed) + padding mask
            s = s + bias_ref[h] + pad_add

            # softmax in f32; EXACT divide for the denominator
            s = s - jnp.max(s, axis=-1, keepdims=True)
            e = jnp.exp(s)
            p = e / jnp.sum(e, axis=-1, keepdims=True)
            # TODO(synk): attn/resid dropout skipped (dropout_p treated as 0 / eval mode).
            if with_scores:
                scores_ref[0, h] = p.astype(jnp.bfloat16)      # full (L, L) store

            oh = jnp.dot(p.astype(jnp.bfloat16), vh,
                         preferred_element_type=jnp.float32)   # (L, DH) f32
            ctx_ref[:, h * DH:(h + 1) * DH] = oh.astype(jnp.bfloat16)

        # ---- ONE combined output projection (K = QKV) + residual ----
        out_ref[0] = x + jnp.dot(ctx_ref[...], wout_ref[...],
                                 preferred_element_type=jnp.float32)

    return kernel


def retro_decoder_self_attention(x, attention_mask, params, num_heads,
                                 return_scores=True):
    """Forward pass equivalent to RetroDecoderSelfAttention.forward with
    past_key_value=None. Returns (output, attention_scores_or_None, (k, v))."""
    B, L, H = x.shape
    wqkv_t = params["wqkv_t"]     # (H, 3*QKV)   == qkv_proj.weight.T
    wout_t = params["wout_t"]     # (QKV, H)     == final_proj.weight.T
    scale = params["rms_scale"]   # (H,)
    rel_emb = params["rel_emb"]   # (num_buckets, NH)

    QKV = wqkv_t.shape[1] // 3
    NH = num_heads
    DH = QKV // NH
    NB = rel_emb.shape[0]

    # ---- batch-invariant relative-position bias + causal mask, precomputed
    # once in the wrapper and DMA'd once (constant index_map). ----
    ctx_pos = jnp.arange(L, dtype=jnp.int32)[:, None]
    mem_pos = jnp.arange(L, dtype=jnp.int32)[None, :]
    # linear buckets, bidirectional=False: clamp(mem-ctx, -(NB-1), 0) + (NB-1)
    buckets = jnp.clip(mem_pos - ctx_pos, -(NB - 1), 0) + (NB - 1)   # (L, L)
    bias = jnp.transpose(rel_emb.astype(jnp.float32)[buckets], (2, 0, 1))  # (NH,L,L)
    causal = jnp.where(mem_pos <= ctx_pos, 0.0, NEG).astype(jnp.float32)
    bias_causal = bias + causal[None]                                  # (NH, L, L)

    mask3 = attention_mask.astype(jnp.float32).reshape(B, 1, L)
    scale2 = scale.astype(jnp.float32).reshape(1, H)

    kernel = _make_kernel(L, H, QKV, NH, DH, return_scores)

    out_shape = [jax.ShapeDtypeStruct((B, L, H), jnp.float32)]
    out_specs = [pl.BlockSpec((1, L, H), lambda b: (b, 0, 0))]
    if return_scores:
        out_shape.append(jax.ShapeDtypeStruct((B, NH, L, L), jnp.bfloat16))
        out_specs.append(pl.BlockSpec((1, NH, L, L), lambda b: (b, 0, 0, 0)))
    out_shape += [jax.ShapeDtypeStruct((B, L, QKV), jnp.bfloat16),
                  jax.ShapeDtypeStruct((B, L, QKV), jnp.bfloat16)]
    out_specs += [pl.BlockSpec((1, L, QKV), lambda b: (b, 0, 0)),
                  pl.BlockSpec((1, L, QKV), lambda b: (b, 0, 0))]

    # grid=(B,): at B>=2 both v7x TensorCores get work via the "parallel" axis.
    # (For B==1 add a second parallel axis over heads / query tiles.)
    grid_spec = pltpu.PrefetchScalarGridSpec(
        num_scalar_prefetch=0,
        grid=(B,),
        in_specs=[
            pl.BlockSpec((1, L, H), lambda b: (b, 0, 0)),       # x (f32)
            pl.BlockSpec((1, 1, L), lambda b: (b, 0, 0)),       # attention_mask
            pl.BlockSpec((1, H), lambda b: (0, 0)),             # rms scale
            pl.BlockSpec((H, 3 * QKV), lambda b: (0, 0)),       # W_qkv^T (bf16)
            pl.BlockSpec((QKV, H), lambda b: (0, 0)),           # W_out^T (bf16)
            pl.BlockSpec((NH, L, L), lambda b: (0, 0, 0)),      # bias + causal (f32)
        ],
        out_specs=out_specs,
        scratch_shapes=[pltpu.VMEM((L, QKV), jnp.bfloat16)],    # packed PV context
    )

    results = pl.pallas_call(
        kernel,
        out_shape=tuple(out_shape),
        grid_spec=grid_spec,
        compiler_params=pltpu.CompilerParams(
            dimension_semantics=("parallel",),
            vmem_limit_bytes=48 * 1024 * 1024),   # explicit, with headroom on v7x
    )(x.astype(jnp.float32), mask3, scale2,
      wqkv_t.astype(jnp.bfloat16), wout_t.astype(jnp.bfloat16),
      bias_causal)

    if return_scores:
        out, scores, k_dense, v_dense = results
    else:
        out, k_dense, v_dense = results
        scores = None

    # head split of the lane-dense K/V outputs (cheap XLA reshape/transpose)
    k = k_dense.reshape(B, L, NH, DH).transpose(0, 2, 1, 3)
    v = v_dense.reshape(B, L, NH, DH).transpose(0, 2, 1, 3)
    return out, scores, (k, v)


def reference(x, attention_mask, params, num_heads):
    """Plain-JAX f32 reference mirroring the PyTorch forward (for verification)."""
    wqkv_t, wout_t = params["wqkv_t"], params["wout_t"]
    scale, rel_emb = params["rms_scale"], params["rel_emb"]
    B, L, H = x.shape
    QKV = wqkv_t.shape[1] // 3
    NH, DH, NB = num_heads, (wqkv_t.shape[1] // 3) // num_heads, rel_emb.shape[0]

    residual = x
    norm = jnp.linalg.norm(x, axis=-1, keepdims=True)
    rms = norm / jnp.sqrt(float(H))
    xn = x / (rms + EPS) * scale

    qkv = xn @ wqkv_t
    q, k, v = jnp.split(qkv, 3, axis=-1)
    to_heads = lambda t: t.reshape(B, L, NH, DH).transpose(0, 2, 1, 3)
    q, k, v = to_heads(q), to_heads(k), to_heads(v)

    scores = q @ jnp.swapaxes(k, -1, -2)
    ctx = jnp.arange(L)[:, None]
    mem = jnp.arange(L)[None, :]
    buckets = jnp.clip(mem - ctx, -(NB - 1), 0) + (NB - 1)
    bias = jnp.transpose(rel_emb[buckets], (2, 0, 1))
    am = (1.0 - attention_mask)[:, None, None, :] * -10000.0
    cm = jnp.where(mem <= ctx, 0.0, -10000.0)[None, None]
    scores = scores + bias[None] + am + cm
    probs = jax.nn.softmax(scores, axis=-1)
    out = probs @ v
    out = out.transpose(0, 2, 1, 3).reshape(B, L, QKV)
    out = out @ wout_t + residual
    return out, probs, (k, v)


if __name__ == "__main__":
    # Small shapes consistent with the module.
    B, L, H = 2, 8, 32          # batch, seq_len, hidden_size
    QKV = 32                    # qkv_size
    NH = 4                      # num_heads
    NB = 8                      # pos_bias_num_buckets

    key = jax.random.PRNGKey(0)
    k_x, k_qkv, k_out, k_scale, k_rel = jax.random.split(key, 5)

    x = jax.random.normal(k_x, (B, L, H), dtype=jnp.float32)
    attention_mask = jnp.ones((B, L), dtype=jnp.float32)
    attention_mask = attention_mask.at[1, -1].set(0.0)   # mask one pad position

    # Deterministic synthetic parameters (module init shapes; stored transposed
    # so the kernel computes x @ W^T directly).
    params = {
        "wqkv_t": 0.05 * jax.random.normal(k_qkv, (H, 3 * QKV), dtype=jnp.float32),
        "wout_t": 0.05 * jax.random.normal(k_out, (QKV, H), dtype=jnp.float32),
        "rms_scale": 1.0 + 0.1 * jax.random.normal(k_scale, (H,), dtype=jnp.float32),
        "rel_emb": 0.1 * jax.random.normal(k_rel, (NB, NH), dtype=jnp.float32),
    }

    out, scores, (kk, vv) = retro_decoder_self_attention(x, attention_mask, params, NH)
    jax.block_until_ready((out, scores, kk, vv))

    # gated-scores path (no probabilities emitted) also compiles / runs
    out2, _, _ = retro_decoder_self_attention(x, attention_mask, params, NH,
                                              return_scores=False)
    jax.block_until_ready(out2)

    ref_out, ref_scores, (ref_k, ref_v) = reference(x, attention_mask, params, NH)
    # Tolerance accounts for bf16 MXU operands, bf16 scores/k/v outputs, and the
    # approx (EUP) reciprocal in RMSNorm vs the f32 reference.
    TOL = dict(rtol=2e-2, atol=2e-2)
    assert jnp.allclose(out, ref_out, **TOL)
    assert jnp.allclose(out2, ref_out, **TOL)
    assert jnp.allclose(scores.astype(jnp.float32), ref_scores, **TOL)
    assert jnp.allclose(kk.astype(jnp.float32), ref_k, **TOL)
    assert jnp.allclose(vv.astype(jnp.float32), ref_v, **TOL)

    print("KERNEL_OK")
</pallas_src>

<mosaic_0001>
module attributes {stable_mosaic.version = 11 : i64} {
  func.func @kernel(%arg0: i32, %arg1: memref<1x8x32xf32, #tpu.memory_space<vmem>>, %arg2: memref<1x1x8xf32, #tpu.memory_space<vmem>>, %arg3: memref<1x32xf32, #tpu.memory_space<vmem>>, %arg4: memref<32x96xbf16, #tpu.memory_space<vmem>>, %arg5: memref<32x32xbf16, #tpu.memory_space<vmem>>, %arg6: memref<4x8x8xf32, #tpu.memory_space<vmem>>, %arg7: memref<1x8x32xf32, #tpu.memory_space<vmem>>, %arg8: memref<1x4x8x8xbf16, #tpu.memory_space<vmem>>, %arg9: memref<1x8x32xbf16, #tpu.memory_space<vmem>>, %arg10: memref<1x8x32xbf16, #tpu.memory_space<vmem>>, %arg11: memref<8x32xbf16, #tpu.memory_space<vmem>>) attributes {dimension_semantics = [#tpu.dimension_semantics<parallel>], iteration_bounds = array<i64: 2>, scalar_prefetch = 0 : i64, scratch_operands = 1 : i64, tpu.core_type = #tpu.core_type<tc>, window_params = [{transform_indices = @transform_0, window_bounds = array<i64: 1, 8, 32>}, {transform_indices = @transform_1, window_bounds = array<i64: 1, 1, 8>}, {pipeline_mode = #tpu.pipeline_mode<synchronous>, transform_indices = @transform_2, window_bounds = array<i64: 1, 32>}, {pipeline_mode = #tpu.pipeline_mode<synchronous>, transform_indices = @transform_3, window_bounds = array<i64: 32, 96>}, {pipeline_mode = #tpu.pipeline_mode<synchronous>, transform_indices = @transform_4, window_bounds = array<i64: 32, 32>}, {pipeline_mode = #tpu.pipeline_mode<synchronous>, transform_indices = @transform_5, window_bounds = array<i64: 4, 8, 8>}, {transform_indices = @transform_6, window_bounds = array<i64: 1, 8, 32>}, {transform_indices = @transform_7, window_bounds = array<i64: 1, 4, 8, 8>}, {transform_indices = @transform_8, window_bounds = array<i64: 1, 8, 32>}, {transform_indices = @transform_9, window_bounds = array<i64: 1, 8, 32>}]} {
    %c0 = arith.constant 0 : index
    %c0_0 = arith.constant 0 : index
    %c0_1 = arith.constant 0 : index
    %0 = vector.load %arg1[%c0, %c0_0, %c0_1] : memref<1x8x32xf32, #tpu.memory_space<vmem>>, vector<1x8x32xf32>
    %1 = vector.shape_cast %0 : vector<1x8x32xf32> to vector<8x32xf32>
    %2 = arith.mulf %1, %1 : vector<8x32xf32>
    %cst = arith.constant dense<0.000000e+00> : vector<8xf32>
    %3 = vector.multi_reduction <add>, %2, %cst [1] : vector<8x32xf32> to vector<8xf32>
    %4 = vector.shape_cast %3 : vector<8xf32> to vector<8x1xf32>
    %5 = math.sqrt %4 : vector<8x1xf32>
    %cst_2 = arith.constant 0.176776692 : f32
    %6 = vector.broadcast %cst_2 : f32 to vector<8x1xf32>
    %7 = arith.mulf %5, %6 : vector<8x1xf32>
    %cst_3 = arith.constant 9.99999993E-9 : f32
    %8 = vector.broadcast %cst_3 : f32 to vector<8x1xf32>
    %9 = arith.addf %7, %8 : vector<8x1xf32>
    %10 = tpu.reciprocal %9 {approx = true} : vector<8x1xf32> -> vector<8x1xf32>
    %11 = vector.broadcast %10 : vector<8x1xf32> to vector<8x32xf32>
    %12 = arith.mulf %1, %11 : vector<8x32xf32>
    %c0_4 = arith.constant 0 : index
    %c0_5 = arith.constant 0 : index
    %13 = vector.load %arg3[%c0_4, %c0_5] : memref<1x32xf32, #tpu.memory_space<vmem>>, vector<1x32xf32>
    %14 = vector.broadcast %13 : vector<1x32xf32> to vector<8x32xf32>
    %15 = arith.mulf %12, %14 : vector<8x32xf32>
    %16 = arith.truncf %15 : vector<8x32xf32> to vector<8x32xbf16>
    %c0_6 = arith.constant 0 : index
    %c0_7 = arith.constant 0 : index
    %17 = vector.load %arg4[%c0_6, %c0_7] : memref<32x96xbf16, #tpu.memory_space<vmem>>, vector<32x96xbf16>
    %cst_8 = arith.constant dense<0.000000e+00> : vector<8x96xf32>
    %18 = tpu.matmul %16, %17, %cst_8 {dimension_numbers = #tpu.dot_dimension_numbers<[1], [0], [0], [1], [0, 0, 1, 1], [], []>} : vector<8x32xbf16>, vector<32x96xbf16>, vector<8x96xf32> -> vector<8x96xf32>
    %19 = vector.extract_strided_slice %18 {offsets = [0, 32], sizes = [8, 32], strides = [1, 1]} : vector<8x96xf32> to vector<8x32xf32>
    %20 = arith.truncf %19 : vector<8x32xf32> to vector<8x32xbf16>
    %c0_9 = arith.constant 0 : index
    %c0_10 = arith.constant 0 : index
    %c0_11 = arith.constant 0 : index
    %21 = vector.load %arg9[%c0_9, %c0_10, %c0_11] : memref<1x8x32xbf16, #tpu.memory_space<vmem>>, vector<1x8x32xbf16>
    %22 = vector.shape_cast %21 : vector<1x8x32xbf16> to vector<8x32xbf16>
    %23 = vector.shape_cast %20 : vector<8x32xbf16> to vector<1x8x32xbf16>
    tpu.vector_store %arg9[%c0_9, %c0_10, %c0_11], %23 {strides = array<i32>} : memref<1x8x32xbf16, #tpu.memory_space<vmem>>, vector<1x8x32xbf16>,
    %24 = vector.extract_strided_slice %18 {offsets = [0, 64], sizes = [8, 32], strides = [1, 1]} : vector<8x96xf32> to vector<8x32xf32>
    %25 = arith.truncf %24 : vector<8x32xf32> to vector<8x32xbf16>
    %c0_12 = arith.constant 0 : index
    %c0_13 = arith.constant 0 : index
    %c0_14 = arith.constant 0 : index
    %26 = vector.load %arg10[%c0_12, %c0_13, %c0_14] : memref<1x8x32xbf16, #tpu.memory_space<vmem>>, vector<1x8x32xbf16>
    %27 = vector.shape_cast %26 : vector<1x8x32xbf16> to vector<8x32xbf16>
    %28 = vector.shape_cast %25 : vector<8x32xbf16> to vector<1x8x32xbf16>
    tpu.vector_store %arg10[%c0_12, %c0_13, %c0_14], %28 {strides = array<i32>} : memref<1x8x32xbf16, #tpu.memory_space<vmem>>, vector<1x8x32xbf16>,
    %29 = arith.truncf %18 : vector<8x96xf32> to vector<8x96xbf16>
    %c0_15 = arith.constant 0 : index
    %c0_16 = arith.constant 0 : index
    %c0_17 = arith.constant 0 : index
    %30 = vector.load %arg2[%c0_15, %c0_16, %c0_17] : memref<1x1x8xf32, #tpu.memory_space<vmem>>, vector<1x1x8xf32>
    %31 = vector.shape_cast %30 : vector<1x1x8xf32> to vector<1x8xf32>
    %cst_18 = arith.constant 1.000000e+00 : f32
    %32 = vector.broadcast %cst_18 : f32 to vector<1x8xf32>
    %33 = arith.subf %32, %31 : vector<1x8xf32>
    %cst_19 = arith.constant -1.000000e+04 : f32
    %34 = vector.broadcast %cst_19 : f32 to vector<1x8xf32>
    %35 = arith.mulf %33, %34 : vector<1x8xf32>
    %36 = vector.extract_strided_slice %29 {offsets = [0, 0], sizes = [8, 8], strides = [1, 1]} : vector<8x96xbf16> to vector<8x8xbf16>
    %37 = vector.extract_strided_slice %29 {offsets = [0, 32], sizes = [8, 8], strides = [1, 1]} : vector<8x96xbf16> to vector<8x8xbf16>
    %38 = vector.extract_strided_slice %29 {offsets = [0, 64], sizes = [8, 8], strides = [1, 1]} : vector<8x96xbf16> to vector<8x8xbf16>
    %cst_20 = arith.constant dense<0.000000e+00> : vector<8x8xf32>
    %39 = tpu.matmul %36, %37, %cst_20 {dimension_numbers = #tpu.dot_dimension_numbers<[1], [1], [0], [0], [0, 0, 1, 0], [], []>} : vector<8x8xbf16>, vector<8x8xbf16>, vector<8x8xf32> -> vector<8x8xf32>
    %c0_21 = arith.constant 0 : index
    %c0_22 = arith.constant 0 : index
    %c0_23 = arith.constant 0 : index
    %40 = vector.load %arg6[%c0_21, %c0_22, %c0_23] : memref<4x8x8xf32, #tpu.memory_space<vmem>>, vector<1x8x8xf32>
    %41 = vector.shape_cast %40 : vector<1x8x8xf32> to vector<8x8xf32>
    %42 = arith.addf %39, %41 : vector<8x8xf32>
    %43 = vector.broadcast %35 : vector<1x8xf32> to vector<8x8xf32>
    %44 = arith.addf %42, %43 : vector<8x8xf32>
    %cst_24 = arith.constant dense<0xFF800000> : vector<8xf32>
    %45 = vector.multi_reduction <maximumf>, %44, %cst_24 [1] : vector<8x8xf32> to vector<8xf32>
    %46 = vector.shape_cast %45 : vector<8xf32> to vector<8x1xf32>
    %47 = vector.broadcast %46 : vector<8x1xf32> to vector<8x8xf32>
    %48 = arith.subf %44, %47 : vector<8x8xf32>
    %49 = math.exp %48 : vector<8x8xf32>
    %cst_25 = arith.constant dense<0.000000e+00> : vector<8xf32>
    %50 = vector.multi_reduction <add>, %49, %cst_25 [1] : vector<8x8xf32> to vector<8xf32>
    %51 = vector.shape_cast %50 : vector<8xf32> to vector<8x1xf32>
    %52 = vector.broadcast %51 : vector<8x1xf32> to vector<8x8xf32>
    %53 = arith.divf %49, %52 : vector<8x8xf32>
    %54 = arith.truncf %53 : vector<8x8xf32> to vector<8x8xbf16>
    %c0_26 = arith.constant 0 : index
    %c0_27 = arith.constant 0 : index
    %c0_28 = arith.constant 0 : index
    %c0_29 = arith.constant 0 : index
    %55 = vector.load %arg8[%c0_26, %c0_27, %c0_28, %c0_29] : memref<1x4x8x8xbf16, #tpu.memory_space<vmem>>, vector<1x1x8x8xbf16>
    %56 = vector.shape_cast %55 : vector<1x1x8x8xbf16> to vector<8x8xbf16>
    %57 = vector.shape_cast %54 : vector<8x8xbf16> to vector<1x1x8x8xbf16>
    tpu.vector_store %arg8[%c0_26, %c0_27, %c0_28, %c0_29], %57 {strides = array<i32>} : memref<1x4x8x8xbf16, #tpu.memory_space<vmem>>, vector<1x1x8x8xbf16>,
    %58 = arith.truncf %53 : vector<8x8xf32> to vector<8x8xbf16>
    %cst_30 = arith.constant dense<0.000000e+00> : vector<8x8xf32>
    %59 = tpu.matmul %58, %38, %cst_30 {dimension_numbers = #tpu.dot_dimension_numbers<[1], [0], [0], [1], [0, 0, 1, 1], [], []>} : vector<8x8xbf16>, vector<8x8xbf16>, vector<8x8xf32> -> vector<8x8xf32>
    %60 = arith.truncf %59 : vector<8x8xf32> to vector<8x8xbf16>
    %c0_31 = arith.constant 0 : index
    %c0_32 = arith.constant 0 : index
    %61 = vector.load %arg11[%c0_31, %c0_32] : memref<8x32xbf16, #tpu.memory_space<vmem>>, vector<8x8xbf16>
    tpu.vector_store %arg11[%c0_31, %c0_32], %60 {strides = array<i32>} : memref<8x32xbf16, #tpu.memory_space<vmem>>, vector<8x8xbf16>,
    %62 = vector.extract_strided_slice %29 {offsets = [0, 8], sizes = [8, 8], strides = [1, 1]} : vector<8x96xbf16> to vector<8x8xbf16>
    %63 = vector.extract_strided_slice %29 {offsets = [0, 40], sizes = [8, 8], strides = [1, 1]} : vector<8x96xbf16> to vector<8x8xbf16>
    %64 = vector.extract_strided_slice %29 {offsets = [0, 72], sizes = [8, 8], strides = [1, 1]} : vector<8x96xbf16> to vector<8x8xbf16>
    %cst_33 = arith.constant dense<0.000000e+00> : vector<8x8xf32>
    %65 = tpu.matmul %62, %63, %cst_33 {dimension_numbers = #tpu.dot_dimension_numbers<[1], [1], [0], [0], [0, 0, 1, 0], [], []>} : vector<8x8xbf16>, vector<8x8xbf16>, vector<8x8xf32> -> vector<8x8xf32>
    %c1 = arith.constant 1 : index
    %c0_34 = arith.constant 0 : index
    %c0_35 = arith.constant 0 : index
    %66 = vector.load %arg6[%c1, %c0_34, %c0_35] : memref<4x8x8xf32, #tpu.memory_space<vmem>>, vector<1x8x8xf32>
    %67 = vector.shape_cast %66 : vector<1x8x8xf32> to vector<8x8xf32>
    %68 = arith.addf %65, %67 : vector<8x8xf32>
    %69 = vector.broadcast %35 : vector<1x8xf32> to vector<8x8xf32>
    %70 = arith.addf %68, %69 : vector<8x8xf32>
    %cst_36 = arith.constant dense<0xFF800000> : vector<8xf32>
    %71 = vector.multi_reduction <maximumf>, %70, %cst_36 [1] : vector<8x8xf32> to vector<8xf32>
    %72 = vector.shape_cast %71 : vector<8xf32> to vector<8x1xf32>
    %73 = vector.broadcast %72 : vector<8x1xf32> to vector<8x8xf32>
    %74 = arith.subf %70, %73 : vector<8x8xf32>
    %75 = math.exp %74 : vector<8x8xf32>
    %cst_37 = arith.constant dense<0.000000e+00> : vector<8xf32>
    %76 = vector.multi_reduction <add>, %75, %cst_37 [1] : vector<8x8xf32> to vector<8xf32>
    %77 = vector.shape_cast %76 : vector<8xf32> to vector<8x1xf32>
    %78 = vector.broadcast %77 : vector<8x1xf32> to vector<8x8xf32>
    %79 = arith.divf %75, %78 : vector<8x8xf32>
    %80 = arith.truncf %79 : vector<8x8xf32> to vector<8x8xbf16>
    %c0_38 = arith.constant 0 : index
    %c1_39 = arith.constant 1 : index
    %c0_40 = arith.constant 0 : index
    %c0_41 = arith.constant 0 : index
    %81 = vector.load %arg8[%c0_38, %c1_39, %c0_40, %c0_41] : memref<1x4x8x8xbf16, #tpu.memory_space<vmem>>, vector<1x1x8x8xbf16>
    %82 = vector.shape_cast %81 : vector<1x1x8x8xbf16> to vector<8x8xbf16>
    %83 = vector.shape_cast %80 : vector<8x8xbf16> to vector<1x1x8x8xbf16>
    tpu.vector_store %arg8[%c0_38, %c1_39, %c0_40, %c0_41], %83 {strides = array<i32>} : memref<1x4x8x8xbf16, #tpu.memory_space<vmem>>, vector<1x1x8x8xbf16>,
    %84 = arith.truncf %79 : vector<8x8xf32> to vector<8x8xbf16>
    %cst_42 = arith.constant dense<0.000000e+00> : vector<8x8xf32>
    %85 = tpu.matmul %84, %64, %cst_42 {dimension_numbers = #tpu.dot_dimension_numbers<[1], [0], [0], [1], [0, 0, 1, 1], [], []>} : vector<8x8xbf16>, vector<8x8xbf16>, vector<8x8xf32> -> vector<8x8xf32>
    %86 = arith.truncf %85 : vector<8x8xf32> to vector<8x8xbf16>
    %c0_43 = arith.constant 0 : index
    %c8 = arith.constant 8 : index
    %87 = vector.load %arg11[%c0_43, %c8] : memref<8x32xbf16, #tpu.memory_space<vmem>>, vector<8x8xbf16>
    tpu.vector_store %arg11[%c0_43, %c8], %86 {strides = array<i32>} : memref<8x32xbf16, #tpu.memory_space<vmem>>, vector<8x8xbf16>,
    %88 = vector.extract_strided_slice %29 {offsets = [0, 16], sizes = [8, 8], strides = [1, 1]} : vector<8x96xbf16> to vector<8x8xbf16>
    %89 = vector.extract_strided_slice %29 {offsets = [0, 48], sizes = [8, 8], strides = [1, 1]} : vector<8x96xbf16> to vector<8x8xbf16>
    %90 = vector.extract_strided_slice %29 {offsets = [0, 80], sizes = [8, 8], strides = [1, 1]} : vector<8x96xbf16> to vector<8x8xbf16>
    %cst_44 = arith.constant dense<0.000000e+00> : vector<8x8xf32>
    %91 = tpu.matmul %88, %89, %cst_44 {dimension_numbers = #tpu.dot_dimension_numbers<[1], [1], [0], [0], [0, 0, 1, 0], [], []>} : vector<8x8xbf16>, vector<8x8xbf16>, vector<8x8xf32> -> vector<8x8xf32>
    %c2 = arith.constant 2 : index
    %c0_45 = arith.constant 0 : index
    %c0_46 = arith.constant 0 : index
    %92 = vector.load %arg6[%c2, %c0_45, %c0_46] : memref<4x8x8xf32, #tpu.memory_space<vmem>>, vector<1x8x8xf32>
    %93 = vector.shape_cast %92 : vector<1x8x8xf32> to vector<8x8xf32>
    %94 = arith.addf %91, %93 : vector<8x8xf32>
    %95 = vector.broadcast %35 : vector<1x8xf32> to vector<8x8xf32>
    %96 = arith.addf %94, %95 : vector<8x8xf32>
    %cst_47 = arith.constant dense<0xFF800000> : vector<8xf32>
    %97 = vector.multi_reduction <maximumf>, %96, %cst_47 [1] : vector<8x8xf32> to vector<8xf32>
    %98 = vector.shape_cast %97 : vector<8xf32> to vector<8x1xf32>
    %99 = vector.broadcast %98 : vector<8x1xf32> to vector<8x8xf32>
    %100 = arith.subf %96, %99 : vector<8x8xf32>
    %101 = math.exp %100 : vector<8x8xf32>
    %cst_48 = arith.constant dense<0.000000e+00> : vector<8xf32>
    %102 = vector.multi_reduction <add>, %101, %cst_48 [1] : vector<8x8xf32> to vector<8xf32>
    %103 = vector.shape_cast %102 : vector<8xf32> to vector<8x1xf32>
    %104 = vector.broadcast %103 : vector<8x1xf32> to vector<8x8xf32>
    %105 = arith.divf %101, %104 : vector<8x8xf32>
    %106 = arith.truncf %105 : vector<8x8xf32> to vector<8x8xbf16>
    %c0_49 = arith.constant 0 : index
    %c2_50 = arith.constant 2 : index
    %c0_51 = arith.constant 0 : index
    %c0_52 = arith.constant 0 : index
    %107 = vector.load %arg8[%c0_49, %c2_50, %c0_51, %c0_52] : memref<1x4x8x8xbf16, #tpu.memory_space<vmem>>, vector<1x1x8x8xbf16>
    %108 = vector.shape_cast %107 : vector<1x1x8x8xbf16> to vector<8x8xbf16>
    %109 = vector.shape_cast %106 : vector<8x8xbf16> to vector<1x1x8x8xbf16>
    tpu.vector_store %arg8[%c0_49, %c2_50, %c0_51, %c0_52], %109 {strides = array<i32>} : memref<1x4x8x8xbf16, #tpu.memory_space<vmem>>, vector<1x1x8x8xbf16>,
    %110 = arith.truncf %105 : vector<8x8xf32> to vector<8x8xbf16>
    %cst_53 = arith.constant dense<0.000000e+00> : vector<8x8xf32>
    %111 = tpu.matmul %110, %90, %cst_53 {dimension_numbers = #tpu.dot_dimension_numbers<[1], [0], [0], [1], [0, 0, 1, 1], [], []>} : vector<8x8xbf16>, vector<8x8xbf16>, vector<8x8xf32> -> vector<8x8xf32>
    %112 = arith.truncf %111 : vector<8x8xf32> to vector<8x8xbf16>
    %c0_54 = arith.constant 0 : index
    %c16 = arith.constant 16 : index
    %113 = vector.load %arg11[%c0_54, %c16] : memref<8x32xbf16, #tpu.memory_space<vmem>>, vector<8x8xbf16>
    tpu.vector_store %arg11[%c0_54, %c16], %112 {strides = array<i32>} : memref<8x32xbf16, #tpu.memory_space<vmem>>, vector<8x8xbf16>,
    %114 = vector.extract_strided_slice %29 {offsets = [0, 24], sizes = [8, 8], strides = [1, 1]} : vector<8x96xbf16> to vector<8x8xbf16>
    %115 = vector.extract_strided_slice %29 {offsets = [0, 56], sizes = [8, 8], strides = [1, 1]} : vector<8x96xbf16> to vector<8x8xbf16>
    %116 = vector.extract_strided_slice %29 {offsets = [0, 88], sizes = [8, 8], strides = [1, 1]} : vector<8x96xbf16> to vector<8x8xbf16>
    %cst_55 = arith.constant dense<0.000000e+00> : vector<8x8xf32>
    %117 = tpu.matmul %114, %115, %cst_55 {dimension_numbers = #tpu.dot_dimension_numbers<[1], [1], [0], [0], [0, 0, 1, 0], [], []>} : vector<8x8xbf16>, vector<8x8xbf16>, vector<8x8xf32> -> vector<8x8xf32>
    %c3 = arith.constant 3 : index
    %c0_56 = arith.constant 0 : index
    %c0_57 = arith.constant 0 : index
    %118 = vector.load %arg6[%c3, %c0_56, %c0_57] : memref<4x8x8xf32, #tpu.memory_space<vmem>>, vector<1x8x8xf32>
    %119 = vector.shape_cast %118 : vector<1x8x8xf32> to vector<8x8xf32>
    %120 = arith.addf %117, %119 : vector<8x8xf32>
    %121 = vector.broadcast %35 : vector<1x8xf32> to vector<8x8xf32>
    %122 = arith.addf %120, %121 : vector<8x8xf32>
    %cst_58 = arith.constant dense<0xFF800000> : vector<8xf32>
    %123 = vector.multi_reduction <maximumf>, %122, %cst_58 [1] : vector<8x8xf32> to vector<8xf32>
    %124 = vector.shape_cast %123 : vector<8xf32> to vector<8x1xf32>
    %125 = vector.broadcast %124 : vector<8x1xf32> to vector<8x8xf32>
    %126 = arith.subf %122, %125 : vector<8x8xf32>
    %127 = math.exp %126 : vector<8x8xf32>
    %cst_59 = arith.constant dense<0.000000e+00> : vector<8xf32>
    %128 = vector.multi_reduction <add>, %127, %cst_59 [1] : vector<8x8xf32> to vector<8xf32>
    %129 = vector.shape_cast %128 : vector<8xf32> to vector<8x1xf32>
    %130 = vector.broadcast %129 : vector<8x1xf32> to vector<8x8xf32>
    %131 = arith.divf %127, %130 : vector<8x8xf32>
    %132 = arith.truncf %131 : vector<8x8xf32> to vector<8x8xbf16>
    %c0_60 = arith.constant 0 : index
    %c3_61 = arith.constant 3 : index
    %c0_62 = arith.constant 0 : index
    %c0_63 = arith.constant 0 : index
    %133 = vector.load %arg8[%c0_60, %c3_61, %c0_62, %c0_63] : memref<1x4x8x8xbf16, #tpu.memory_space<vmem>>, vector<1x1x8x8xbf16>
    %134 = vector.shape_cast %133 : vector<1x1x8x8xbf16> to vector<8x8xbf16>
    %135 = vector.shape_cast %132 : vector<8x8xbf16> to vector<1x1x8x8xbf16>
    tpu.vector_store %arg8[%c0_60, %c3_61, %c0_62, %c0_63], %135 {strides = array<i32>} : memref<1x4x8x8xbf16, #tpu.memory_space<vmem>>, vector<1x1x8x8xbf16>,
    %136 = arith.truncf %131 : vector<8x8xf32> to vector<8x8xbf16>
    %cst_64 = arith.constant dense<0.000000e+00> : vector<8x8xf32>
    %137 = tpu.matmul %136, %116, %cst_64 {dimension_numbers = #tpu.dot_dimension_numbers<[1], [0], [0], [1], [0, 0, 1, 1], [], []>} : vector<8x8xbf16>, vector<8x8xbf16>, vector<8x8xf32> -> vector<8x8xf32>
    %138 = arith.truncf %137 : vector<8x8xf32> to vector<8x8xbf16>
    %c0_65 = arith.constant 0 : index
    %c24 = arith.constant 24 : index
    %139 = vector.load %arg11[%c0_65, %c24] : memref<8x32xbf16, #tpu.memory_space<vmem>>, vector<8x8xbf16>
    tpu.vector_store %arg11[%c0_65, %c24], %138 {strides = array<i32>} : memref<8x32xbf16, #tpu.memory_space<vmem>>, vector<8x8xbf16>,
    %c0_66 = arith.constant 0 : index
    %c0_67 = arith.constant 0 : index
    %140 = vector.load %arg11[%c0_66, %c0_67] : memref<8x32xbf16, #tpu.memory_space<vmem>>, vector<8x32xbf16>
    %c0_68 = arith.constant 0 : index
    %c0_69 = arith.constant 0 : index
    %141 = vector.load %arg5[%c0_68, %c0_69] : memref<32x32xbf16, #tpu.memory_space<vmem>>, vector<32x32xbf16>
    %cst_70 = arith.constant dense<0.000000e+00> : vector<8x32xf32>
    %142 = tpu.matmul %140, %141, %cst_70 {dimension_numbers = #tpu.dot_dimension_numbers<[1], [0], [0], [1], [0, 0, 1, 1], [], []>} : vector<8x32xbf16>, vector<32x32xbf16>, vector<8x32xf32> -> vector<8x32xf32>
    %143 = arith.addf %1, %142 : vector<8x32xf32>
    %c0_71 = arith.constant 0 : index
    %c0_72 = arith.constant 0 : index
    %c0_73 = arith.constant 0 : index
    %144 = vector.load %arg7[%c0_71, %c0_72, %c0_73] : memref<1x8x32xf32, #tpu.memory_space<vmem>>, vector<1x8x32xf32>
    %145 = vector.shape_cast %144 : vector<1x8x32xf32> to vector<8x32xf32>
    %146 = vector.shape_cast %143 : vector<8x32xf32> to vector<1x8x32xf32>
    tpu.vector_store %arg7[%c0_71, %c0_72, %c0_73], %146 {strides = array<i32>} : memref<1x8x32xf32, #tpu.memory_space<vmem>>, vector<1x8x32xf32>,
    return
  }
  func.func @transform_0(%arg0: i32) -> (i32, i32, i32) {
    %c0_i32 = arith.constant 0 : i32
    %c0_i32_0 = arith.constant 0 : i32
    %c0_i32_1 = arith.constant 0 : i32
    return %arg0, %c0_i32, %c0_i32_0 : i32, i32, i32
  }
  func.func @transform_1(%arg0: i32) -> (i32, i32, i32) {
    %c0_i32 = arith.constant 0 : i32
    %c0_i32_0 = arith.constant 0 : i32
    %c0_i32_1 = arith.constant 0 : i32
    return %arg0, %c0_i32, %c0_i32_0 : i32, i32, i32
  }
  func.func @transform_2(%arg0: i32) -> (i32, i32) {
    %c0_i32 = arith.constant 0 : i32
    %c0_i32_0 = arith.constant 0 : i32
    %c0_i32_1 = arith.constant 0 : i32
    return %c0_i32, %c0_i32_0 : i32, i32
  }
  func.func @transform_3(%arg0: i32) -> (i32, i32) {
    %c0_i32 = arith.constant 0 : i32
    %c0_i32_0 = arith.constant 0 : i32
    %c0_i32_1 = arith.constant 0 : i32
    return %c0_i32, %c0_i32_0 : i32, i32
  }
  func.func @transform_4(%arg0: i32) -> (i32, i32) {
    %c0_i32 = arith.constant 0 : i32
    %c0_i32_0 = arith.constant 0 : i32
    %c0_i32_1 = arith.constant 0 : i32
    return %c0_i32, %c0_i32_0 : i32, i32
  }
  func.func @transform_5(%arg0: i32) -> (i32, i32, i32) {
    %c0_i32 = arith.constant 0 : i32
    %c0_i32_0 = arith.constant 0 : i32
    %c0_i32_1 = arith.constant 0 : i32
    %c0_i32_2 = arith.constant 0 : i32
    return %c0_i32, %c0_i32_0, %c0_i32_1 : i32, i32, i32
  }
  func.func @transform_6(%arg0: i32) -> (i32, i32, i32) {
    %c0_i32 = arith.constant 0 : i32
    %c0_i32_0 = arith.constant 0 : i32
    %c0_i32_1 = arith.constant 0 : i32
    return %arg0, %c0_i32, %c0_i32_0 : i32, i32, i32
  }
  func.func @transform_7(%arg0: i32) -> (i32, i32, i32, i32) {
    %c0_i32 = arith.constant 0 : i32
    %c0_i32_0 = arith.constant 0 : i32
    %c0_i32_1 = arith.constant 0 : i32
    %c0_i32_2 = arith.constant 0 : i32
    return %arg0, %c0_i32, %c0_i32_0, %c0_i32_1 : i32, i32, i32, i32
  }
  func.func @transform_8(%arg0: i32) -> (i32, i32, i32) {
    %c0_i32 = arith.constant 0 : i32
    %c0_i32_0 = arith.constant 0 : i32
    %c0_i32_1 = arith.constant 0 : i32
    return %arg0, %c0_i32, %c0_i32_0 : i32, i32, i32
  }
  func.func @transform_9(%arg0: i32) -> (i32, i32, i32) {
    %c0_i32 = arith.constant 0 : i32
    %c0_i32_0 = arith.constant 0 : i32
    %c0_i32_1 = arith.constant 0 : i32
    return %arg0, %c0_i32, %c0_i32_0 : i32, i32, i32
  }
}

</mosaic_0001>

<bundles_post_ra>
// kernel: tpu_custom_call.1
= control target key start
LH: loop header
LB: loop body
LE: loop exit
PB: predicated region body
PF: predicated region fallthrough
CT: control target
= control target key end

     0   :  { %s2460_s0 = inlined_call_operand.hbm [shape: f32[2,8,32], index: 0, kind: input, shape index: {}]   ;;  %s2461_s1 = inlined_call_operand.vmem [shape: f32[2,1,8], index: 1, kind: input, shape index: {}]   ;;  %s2462_s2 = inlined_call_operand.vmem [shape: f32[1,32], index: 2, kind: input, shape index: {}]   ;;  %s2463_s3 = inlined_call_operand.hbm [shape: bf16[32,96], index: 3, kind: input, shape index: {}]   ;;  %s2464_s4 = inlined_call_operand.hbm [shape: bf16[32,32], index: 4, kind: input, shape index: {}]   ;;  %s2465_s5 = inlined_call_operand.hbm [shape: f32[4,8,8], index: 5, kind: input, shape index: {}]   ;;  %s2466_s6 = inlined_call_operand.hbm [shape: f32[2,8,32], index: 6, kind: output, shape index: {0}]   ;;  %s2467_s7 = inlined_call_operand.hbm [shape: bf16[2,4,8,8], index: 7, kind: output, shape index: {1}]   ;;  %s2468_s8 = inlined_call_operand.hbm [shape: bf16[2,8,32], index: 8, kind: output, shape index: {2}]   ;;  %s2469_s9 = inlined_call_operand.hbm [shape: bf16[2,8,32], index: 9, kind: output, shape index: {3}]  }
   0x1   :  { %2479 = sst [smem:[#allocation25_spill]] %s2460_s0 }
   0x2   :  { %2480 = sst [smem:[#allocation26_spill]] %s2461_s1 }
   0x3   :  { %2481 = sst [smem:[#allocation27_spill]] %s2466_s6 }
   0x4   :  { %15 = vsyncpa [#allocation4], 0 }
   0x5   :  { %17 = vsyncpa [#allocation4 + $0x1], 0 }
   0x6   :  { %18 = vsyncpa [#allocation7], 0 }
   0x7   :  { %19 = vsyncpa [#allocation10], 0 }
   0x8   :  { %20 = vsyncpa [#allocation5], 0 }
   0x9   :  { %22 = vsyncpa [#allocation5 + $0x1], 0 }
   0xa   :  { %23 = vsyncpa [#allocation13], 0 }
   0xb   :  { %25 = vsyncpa [#allocation13 + $0x1], 0 }
   0xc   :  { %26 = vsyncpa [#allocation16], 0 }
   0xd   :  { %28 = vsyncpa [#allocation16 + $0x1], 0  ;;  %s2003_s30 = smov 0   ;;  %s2005_s10 = smov 0  }
   0xe   :  { %s2007_s11 = smov 0   ;;  %s2009_s12 = smov 0  }
   0xf LB: > { %2482 = sst [smem:[#allocation23_spill]] %s1910_s30  ;;  %s2024_s13 = sadd.s32 4294967295, %s1922_s12   ;;  %s1922_s12 = sphi %s2009_s12, %s2511_s12   ;;  %s1918_s11 = sphi %s2007_s11, %s2510_s11   ;;  %s1914_s10 = sphi %s2005_s10, %s2509_s10   ;;  %s1910_s30 = sphi %s2003_s30, %s2508_s30  }
  0x10   : > { %s2471_s14 = sadd.s32 4294967294, %s1922_s12   ;;  %p54_p0 = scmp.ne.s32.totalorder %s1914_s10, %s1910_s30 }
  0x11   : > { %p2470_p1 = scmp.eq.s32.totalorder %s2024_s13, 0  ;;  %p194_p3 = scmp.eq.s32.totalorder %s2471_s14, 1 }
  0x12   : > { %p1365_p5 = scmp.ge.s32.totalorder %s1922_s12, 1  ;;  %p279_p7 = scmp.lt.s32.totalorder %s1922_s12, 3 }
  0x13   : > { %p2035_p4 = por %p2470_p1, %p54_p0  ;;  %p2040_p6 = por %p194_p3, %p54_p0 }
  0x14   : > { %p2045_p8 = pnand %p1365_p5, %p279_p7  ;;  %s1924_s18 = smov [#allocation6]  }
  0x15   : > { %s2483_s15 = scalar_select %p2035_p4, 1, 0 }
  0x16   : > { %s2484_s16 = scalar_select %p2040_p6, 1, 0 }
  0x17   : > { %s2486_s17 = scalar_select %p2045_p8, 1, 0 }
  0x18   : > { %2485 = sst [smem:[#allocation24_spill]] %s2484_s16  ;;  %s294_s19 = sshll.u32 %s1924_s18, 4  ;;  %s2049_s19 = int_to_ptr.vmem [resolvable:$true] %s294_s19 }
  0x19   : > { %p1527_p9 = pneg %p2045_p8  ;;  %s1925_s21 = smov [#allocation8]  }
  0x1a   : > { %s307_s22 = sshll.u32 %s1925_s21, 4  ;;  %s1926_s23 = smov [#allocation9]   ;;  %s2060_s22 = int_to_ptr.vmem [resolvable:$true] %s307_s22 }
  0x1b   : > { %p2056_p11 = pnand %p1527_p9, %p2470_p1  ;;  %s2062_s24 = sshll.u32 %s1926_s23, 4  ;;  %s321_s24 = int_to_ptr.vmem [resolvable:$true] %s2062_s24 }
  0x1c   : > { %s1642_s27 = scalar_lea.hbm %s2463_s3, 256 }
  0x1d   : > { %p1643_p12 = scmp.ne.s32.totalorder %s2463_s3, %s1642_s27  ;;  %p2072_p13 = pneg %p2056_p11 }
  0x1e   : > { %p1649_p5 = scmp.lt.u32.totalorder %s1642_s27, %s2463_s3 }
  0x1f   : > { %p1645_p0 = pnand %p2072_p13, %p1643_p12 }
  0x21   : > { %p1646_p3 = pneg %p1645_p0 }
  0x23   : > { %p1651_p7 = pnand %p1649_p5, %p1646_p3 }
  0x25   : > { %1654 = shalt.err (!%p1651_p7)
}
  0x26   : > { %s1655_s25 = scalar_lea.vmem %s2049_s19, 256  ;;  %p1663_p2 = scmp.lt.s32.totalorder %s2049_s19, %s2049_s19 }
  0x27   : > { %p1656_p9 = scmp.ne.s32.totalorder %s2049_s19, %s1655_s25  ;;  %p1664_p6 = scmp.lt.s32.totalorder %s1655_s25, %s1655_s25 }
  0x29   : > { %p1658_p10 = pnand %p1656_p9, %p2072_p13  ;;  %p1665_p12 = por %p1664_p6, %p1663_p2 }
  0x2b   : > { %p1659_p1 = pneg %p1658_p10 }
  0x2d   : > { %p1666_p0 = pnand %p1665_p12, %p1659_p1 }
  0x2f   : > { %1669 = shalt.err (!%p1666_p0)
}
  0x30   : > { %s1927_s26 = smov 64   ;;  %s1928_s27 = smov 4  }
  0x31   : > { %1530 = dma.hbm_to_vmem [thread:$0]  (!%p2056_p11), %s2463_s3, 256, %s2049_s19, [#allocation7], %s1927_s26, %s1927_s26, %s1928_s27  }
  0x32   : > { %s1670_s14 = scalar_lea.hbm %s2464_s4, 256 }
  0x33   : > { %p1671_p2 = scmp.ne.s32.totalorder %s2464_s4, %s1670_s14  ;;  %p1677_p10 = scmp.lt.u32.totalorder %s1670_s14, %s2464_s4 }
  0x35   : > { %p1673_p1 = pnand %p1671_p2, %p2072_p13 }
  0x37   : > { %p1674_p6 = pneg %p1673_p1 }
  0x39   : > { %p1679_p3 = pnand %p1677_p10, %p1674_p6 }
  0x3b   : > { %1682 = shalt.err (!%p1679_p3)
}
  0x3c   : > { %s1683_s19 = scalar_lea.vmem %s2060_s22, 256  ;;  %p1691_p12 = scmp.lt.s32.totalorder %s2060_s22, %s2060_s22 }
  0x3d   : > { %p1684_p5 = scmp.ne.s32.totalorder %s2060_s22, %s1683_s19  ;;  %p1692_p0 = scmp.lt.s32.totalorder %s1683_s19, %s1683_s19 }
  0x3f   : > { %p1686_p7 = pnand %p1684_p5, %p2072_p13  ;;  %p1693_p2 = por %p1692_p0, %p1691_p12 }
  0x41   : > { %p1687_p9 = pneg %p1686_p7 }
  0x43   : > { %p1694_p1 = pnand %p1693_p2, %p1687_p9 }
  0x45   : > { %1697 = shalt.err (!%p1694_p1)
}
  0x46   : > { %1533 = dma.hbm_to_vmem [thread:$0]  (!%p2056_p11), %s2464_s4, 256, %s2060_s22, [#allocation7], %s1927_s26, %s1927_s26, %s1928_s27  }
  0x47   : > { %s1698_s28 = scalar_lea.hbm %s2465_s5, 512 }
  0x48   : > { %p1699_p6 = scmp.ne.s32.totalorder %s2465_s5, %s1698_s28  ;;  %p1705_p5 = scmp.lt.u32.totalorder %s1698_s28, %s2465_s5 }
  0x4a   : > { %p1701_p10 = pnand %p1699_p6, %p2072_p13 }
  0x4c   : > { %p1702_p3 = pneg %p1701_p10 }
  0x4e   : > { %p1707_p7 = pnand %p1705_p5, %p1702_p3 }
  0x50   : > { %1710 = shalt.err (!%p1707_p7)
}
  0x51   : > { %s1711_s19 = scalar_lea.vmem %s321_s24, 512  ;;  %p1719_p2 = scmp.lt.s32.totalorder %s321_s24, %s321_s24 }
  0x52   : > { %p1712_p9 = scmp.ne.s32.totalorder %s321_s24, %s1711_s19  ;;  %p1720_p1 = scmp.lt.s32.totalorder %s1711_s19, %s1711_s19 }
  0x54   : > { %p1714_p12 = pnand %p1712_p9, %p2072_p13  ;;  %p1721_p4 = por %p1720_p1, %p1719_p2 }
  0x56   : > { %p1715_p0 = pneg %p1714_p12 }
  0x58   : > { %p1722_p8 = pnand %p1721_p4, %p1715_p0 }
  0x5a   : > { %1725 = shalt.err (!%p1722_p8)
}
  0x5b   : > { %s1929_s22 = smov 128   ;;  %s1930_s18 = smov 8  }
  0x5c   : > { %1536 = dma.hbm_to_vmem [thread:$0]  (!%p2056_p11), %s2465_s5, 512, %s321_s24, [#allocation10], %s1929_s22, %s1929_s22, %s1930_s18  }
  0x5d   : > { %s2136_s6 = sadd.s32 1, %s1922_s12   ;;  %s41_s14 = sadd.s32 1, %s1918_s11 }
  0x5e   : > { %s38_s30 = ssub.s32 %s1922_s12, %s2136_s6  ;;  %p48_p8 = scmp.ne.s32.totalorder %s1918_s11, %s1914_s10 }
  0x5f   : > { %p39_p4 = scmp.eq.s32.totalorder %s38_s30, 0  ;;  %p49_p13 = scmp.eq.s32.totalorder %s1922_s12, 0 }
  0x60   : > { %p1557_p6 = scmp.lt.s32.totalorder %s1922_s12, 2  ;;  %p2489_p3 = scmp.eq.s32.totalorder %s2024_s13, 1 }
  0x61   : > { %s2146_s16 = scalar_select %p39_p4, %s1918_s11, %s41_s14  }
  0x62   : > { %p50_p10 = por %p49_p13, %p48_p8  ;;  %p2150_p5 = por %p2489_p3, %p48_p8 }
  0x63   : > { %s334_s20 = sand.u32 1, %s1918_s11   ;;  %s1371_s29 = sshll.u32 %s1922_s12, 7 }
  0x64   : > { %s1370_s24 = sshll.u32 %s334_s20, 3  ;;  %s2491_s0 = sld [smem:[#allocation25_spill]] }
  0x65   : > { %s338_s19 = scalar_lea.vmem [#allocation3], %s1370_s24  ;;  %p2161_p11 = pnand %p1557_p6, %p50_p10 }
  0x66   : > { %s345_s22 = sshll.u32 %s338_s19, 4  ;;  %s335_s26 = scalar_lea.sflag [#allocation4], %s334_s20  ;;  %s2165_s22 = int_to_ptr.vmem [resolvable:$true] %s345_s22 }
  0x67   : > { %p1728_p9 = pneg %p2161_p11 }
  0x6a   : > { %s2159_s25 = scalar_lea.hbm %s2491_s0, %s1371_s29  ;;  %s1731_s29 = scalar_lea.hbm %s2491_s0, 256 }
  0x6b   : > { %s1726_s27 = scalar_lea.hbm %s2159_s25, 128  ;;  %p1732_p2 = scmp.lt.u32.totalorder %s2159_s25, %s2491_s0 }
  0x6c   : > { %p1727_p7 = scmp.ne.s32.totalorder %s2159_s25, %s1726_s27  ;;  %p1733_p1 = scmp.lt.u32.totalorder %s1731_s29, %s1726_s27 }
  0x6d   : > { %p1735_p8 = scmp.lt.u32.totalorder %s1726_s27, %s2159_s25 }
  0x6e   : > { %p1729_p12 = pnand %p1728_p9, %p1727_p7  ;;  %p1734_p4 = por %p1733_p1, %p1732_p2 }
  0x70   : > { %p1730_p0 = pneg %p1729_p12  ;;  %p1736_p13 = por %p1735_p8, %p1734_p4 }
  0x72   : > { %p1737_p6 = pnand %p1736_p13, %p1730_p0 }
  0x74   : > { %1740 = shalt.err (!%p1737_p6)
}
  0x75   : > { %s1741_s20 = scalar_lea.vmem %s2165_s22, 128  ;;  %s1931_s23 = smov [#allocation3]  }
  0x76   : > { %p1742_p10 = scmp.ne.s32.totalorder %s2165_s22, %s1741_s20  ;;  %s1746_s19 = sshll.u32 %s1931_s23, 4  ;;  %s1747_s19 = int_to_ptr.vmem [resolvable:$false] %s1746_s19 }
  0x77   : > { %s1748_s30 = scalar_lea.vmem %s1747_s19, 256  ;;  %p1749_p12 = scmp.lt.s32.totalorder %s2165_s22, %s1747_s19 }
  0x78   : > { %p1744_p3 = pnand %p1742_p10, %p1728_p9  ;;  %p1750_p2 = scmp.lt.s32.totalorder %s1748_s30, %s1741_s20 }
  0x7a   : > { %p1745_p7 = pneg %p1744_p3  ;;  %p1751_p1 = por %p1750_p2, %p1749_p12 }
  0x7c   : > { %p1752_p4 = pnand %p1751_p1, %p1745_p7 }
  0x7e   : > { %1755 = shalt.err (!%p1752_p4)
}
  0x7f   : > { %1540 = dma.hbm_to_vmem [thread:$0]  (!%p2161_p11), %s2159_s25, 128, %s2165_s22, %s335_s26  }
  0x80   : > { %p2493_p0 = scmp.ne.s32.totalorder %s2486_s17, 0 }
  0x81   : > { %s2195_s27 = sand.u32 (!%p2493_p0), 1, %s1914_s10   ;;  %p2494_p9 = scmp.ne.s32.totalorder (!%p2493_p0), %s2483_s15, 0 }
  0x82   : > { %360 = sbr.rel (%p2493_p0) target bundleno = 1823 (0x71f), region = 44  ;;  %s2477_s14 = sshll.u32 (!%p2493_p0), %s2195_s27, 3 }
  0x83   : > { %s363_s29 = scalar_lea.sflag (!%p2493_p0), [#allocation4], %s2195_s27  ;;  %s366_s24 = scalar_lea.vmem (!%p2493_p0), [#allocation3], %s2477_s14 }
  0x89   : > { %1885 = dma.done.wait (%p2494_p9), %s363_s29, 128  }
  0x8a   : > { %1887 = vsyncadd (%p2494_p9), %s363_s29, 4294967168  ;;  %p2495_p11 = scmp.eq.s32.totalorder %s2024_s13, 0 }
  0x8c   : > { %1889 = dma.done.wait (%p2495_p11), [#allocation7], 512   ;;  %p2496_p8 = pmov %p2495_p11 }
  0x8e   : > { %1891 = vsyncadd (%p2496_p8), [#allocation7], 4294966784  ;;  %p2497_p13 = pmov %p2496_p8 }
  0x8f   : > { %p2498_p6 = pmov %p2496_p8 }
  0x90   : > { %1893 = dma.done.wait (%p2497_p13), [#allocation10], 512  }
  0x91   : > { %1895 = vsyncadd (%p2498_p6), [#allocation10], 4294966784  ;;  %v2213_v0 = vld [vmem:[%s366_s24] sm:$0xff]  ;;  %vm437_vm0 = vcmask 261120   ;;  %v1618_v3 = vld [vmem:[#allocation6] sm:$0xff]   ;;  %v1932_v4 = vmov 0.0   ;;  %v587_v35 = vlaneseq }
  0x92   : > { %v436_v1 = vmul.f32 %v2213_v0, %v2213_v0  ;;  %1441 = vmatprep.subr.bf16.mxu0 %v1932_v4  ;;  %vm1933_vm1 = vmmov 0   ;;  %v1619_v5 = vld [vmem:[#allocation6 + $0x8] sm:$0xff]   ;;  %1449 = vmatprep.subr.bf16.mxu1 %v1932_v4  ;;  %s1934_s25 = smov 88   ;;  %s1935_s22 = smov 96   ;;  %vm539_vm4 = vcmask 64512   ;;  %v536_v41 = vld [vmem:[#allocation9] sm:$0xff] }
  0x93   : > { %1445 = vmatprep.mubr.msk.bf16.mxu0 %vm1933_vm1, %v1932_v4  ;;  %1442 = vmatpush3.bf16.msra.mxu0 %v1618_v3  ;;  %v1381_v15 = vld [vmem:[%s2462_s2] ss:$0 sm:$0xff]  ;;  %s1936_s18 = smov 120   ;;  %s1937_s26 = smov 80   ;;  %v588_v38 = vshrl.u32 %v587_v35, 7  ;;  %v783_v58 = vld [vmem:[#allocation9 + $0x10] sm:$0xff] }
  0x94   : > { %v438_v2 = vsel %vm437_vm0, %v436_v1, 0.0  ;;  %1443 = vmatprep.subr.bf16.mxu0 %v1932_v4  ;;  %1451 = vmatprep.mubr.msk.bf16.mxu1 %vm1933_vm1, %v1932_v4  ;;  %s1938_s21 = smov 112   ;;  %s1939_s20 = smov 72   ;;  %v659_v50 = vld [vmem:[#allocation9 + $0x8] sm:$0xff]  ;;  %v907_v3 = vld [vmem:[#allocation9 + $0x18] sm:$0xff]  ;;  %vm605_vm5 = vcmask 60416  }
  0x95   : > { %439 = vadd.xlane.f32.xlu0 %v438_v2  ;;  %s1940_s23 = smov 104   ;;  %p431_p10 = scmp.lt.s32.totalorder %s2024_s13, 1  ;;  %v589_v40 = vsub.s32 0, %v588_v38  ;;  %vm612_vm6 = vcmask 1043456   ;;  %vm780_vm7 = vcmask 126016   ;;  %vm904_vm8 = vcmask 191616  }
  0x96   : > { %s2499_s1 = sld [smem:[#allocation26_spill]]  ;;  %s1941_s15 = smov 56   ;;  %vm527_vm9 = vcmask 257024   ;;  %vm1028_vm10 = vcmask 257216  }
  0x97   : > { %1444 = vmatpush3.bf16.msra.mxu0 %v1619_v5  ;;  %s432_s19 = scalar_select %p431_p10, %s2024_s13, 1 }
  0x98   : > { %1455 = vmatprep.subr.bf16.mxu0 %v1932_v4  ;;  %s2478_s17 = smov 64   ;;  %s1379_s30 = sshll.u32 %s2195_s27, 2 }
  0x99   : > { %s2320_s29 = scalar_lea.vmem [#allocation15], %s1379_s30 }
  0x9c   : > { %s433_s24 = scalar_lea.vmem %s2499_s1, %s432_s19  ;;  %s1947_s19 = smov 24  }
  0x9d   : > { %v533_v36 = vld [vmem:[%s433_s24] sm:$0x1]  ;;  %s1097_s24 = sand.u32 1, %s2024_s13  }
  0x9e   : > { %v534_v37 = vsub.f32 1.0, %v533_v36 }
  0xa0   : > { %v535_v39 = vmul.f32 -10000.0, %v534_v37 }
  0xa2   : > { %v590_v42 = vrot.slane %v535_v39, %v589_v40 }
 0x122   : > { %v440_v6 = vpop.xlane.xlu0 %439 }
 0x123   : > { %1622 = vrsqrt.f32 %v440_v6  ;;  %vm443_vm2 = vcmp.eq.f32.partialorder %v440_v6, inf  ;;  %v446_v9 = vand.u32 2147483648, %v440_v6  ;;  %vm445_vm3 = vcmp.eq.f32.partialorder %v440_v6, 0.0 }
 0x12d   : > { %v1623_v7 = vpop.eup %1622 }
 0x12e   : > { %v442_v8 = vmul.f32 %v1623_v7, %v440_v6 }
 0x130   : > { %v444_v10 = vsel %vm443_vm2, %v440_v6, %v442_v8 }
 0x131   : > { %v447_v11 = vsel %vm445_vm3, %v446_v9, %v444_v10 }
 0x132   : > { %v448_v12 = vmul.f32 0.17677669, %v447_v11 }
 0x134   : > { %v449_v13 = vadd.f32 1e-08, %v448_v12 }
 0x136   : > { %1624 = vrcp.f32 %v449_v13 }
 0x140   : > { %v1625_v14 = vpop.eup %1624 }
 0x141   : > { %v451_v16 = vmul.f32 %v1625_v14, %v2213_v0 }
 0x143   : > { %v459_v17 = vmul.f32 %v1381_v15, %v451_v16 }
 0x145   : > { %v460_v18 = vpack.c.bf16 %v459_v17, %v459_v17 }
 0x147   : > { %1446 = vmatmul.mubr.msk.bf16.vlgmr.msra.gmra.mrb[0].mxu0 %vm437_vm0, %v460_v18 }
 0x148   : > { %1457 = vmatprep.mubr.msk.bf16.mxu0 %vm1933_vm1, %v1932_v4 }
 0x21a   : > { %v514_v19 = vpop.f32.mrb[0].mxu0 }
 0x21b   : > { %v2233_v20 = vpack.c.bf16 %v514_v19, %v514_v19  ;;  %v1447_v21 = vpop.f32.mrb[1].mxu0 }
 0x21c   : > { %v517_v22 = vpop.f32.mrb[2].mxu0 }
 0x21d   : > { %662 = vrot.lane.b32.xlu1 %v2233_v20, %s1934_s25  ;;  %537 = vrot.lane.b32.xlu0 %v2233_v20, %s1935_s22  ;;  %v1448_v23 = vpop.f32.mrb[3].mxu0  ;;  %s1943_s25 = smov 40  }
 0x221   : > { %660 = vrot.lane.b32.xlu1 %v2233_v20, %s1936_s18  ;;  %s1944_s18 = smov 48  }
 0x225   : > { %786 = vrot.lane.b32.xlu1 %v2233_v20, %s1937_s26  ;;  %s1378_s26 = sshll.u32 %s2195_s27, 4 }
 0x229   : > { %784 = vrot.lane.b32.xlu1 %v2233_v20, %s1938_s21  ;;  %s2283_s21 = scalar_lea.vmem [#allocation12], %s1378_s26 }
 0x22d   : > { %910 = vrot.lane.b32.xlu1 %v2233_v20, %s1939_s20  ;;  %s1945_s20 = smov 8  }
 0x231   : > { %908 = vrot.lane.b32.xlu1 %v2233_v20, %s1940_s23  ;;  %s1946_s23 = smov 16  }
 0x28f   : > { %v663_v24 = vpop.permute.xlu1 %662  ;;  %v538_v25 = vpop.permute.xlu0 %537 }
 0x290   : > { %v544_v26 = vsel %vm539_vm4, %v538_v25, 0  ;;  %v668_v28 = vsel %vm539_vm4, %v663_v24, 0 }
 0x291   : > { %1450 = vmatpush3.bf16.xpose.msra.mxu1 %v544_v26 }
 0x292   : > { %1461 = vmatprep.subr.bf16.mxu1 %v1932_v4 }
 0x293   : > { %v661_v27 = vpop.permute.xlu1 %660 }
 0x297   : > { %v787_v29 = vpop.permute.xlu1 %786 }
 0x298   : > { %1452 = vmatmul.mubr.msk.bf16.vlgmr.msra.gmra.mrb[0].mxu1 %vm539_vm4, %v2233_v20  ;;  %v792_v31 = vsel %vm539_vm4, %v787_v29, 0 }
 0x299   : > { %1462 = vmatpush3.bf16.xpose.msra.mxu1 %v668_v28  ;;  %1463 = vmatprep.mubr.msk.bf16.mxu1 %vm1933_vm1, %v1932_v4 }
 0x29a   : > { %1473 = vmatprep.subr.bf16.mxu1 %v1932_v4 }
 0x29b   : > { %v785_v30 = vpop.permute.xlu1 %784 }
 0x29f   : > { %v911_v32 = vpop.permute.xlu1 %910 }
 0x2a0   : > { %1464 = vmatmul.mubr.msk.bf16.vlgmr.msra.gmra.mrb[4].mxu1 %vm539_vm4, %v661_v27  ;;  %v916_v33 = vsel %vm539_vm4, %v911_v32, 0 }
 0x2a1   : > { %1474 = vmatpush3.bf16.xpose.msra.mxu1 %v792_v31  ;;  %1475 = vmatprep.mubr.msk.bf16.mxu1 %vm1933_vm1, %v1932_v4 }
 0x2a2   : > { %1485 = vmatprep.subr.bf16.mxu1 %v1932_v4 }
 0x2a3   : > { %v909_v34 = vpop.permute.xlu1 %908 }
 0x2a8   : > { %1476 = vmatmul.mubr.msk.bf16.vlgmr.msra.gmra.mrb[8].mxu1 %vm539_vm4, %v785_v30 }
 0x2a9   : > { %1486 = vmatpush3.bf16.xpose.msra.mxu1 %v916_v33  ;;  %1487 = vmatprep.mubr.msk.bf16.mxu1 %vm1933_vm1, %v1932_v4 }
 0x2aa   : > { %1497 = vmatprep.subr.bf16.mxu1 %v1932_v4 }
 0x2b0   : > { %1488 = vmatmul.mubr.msk.bf16.vlgmr.msra.gmra.mrb[12].mxu1 %vm539_vm4, %v909_v34 }
 0x2b1   : > { %1501 = vmatprep.mubr.msk.bf16.mxu1 %vm1933_vm1, %v1932_v4 }
 0x36b   : > { %v580_v43 = vpop.f32.mrb[0].mxu1 }
 0x36c   : > { %v581_v44 = vadd.f32 %v580_v43, %v536_v41  ;;  %v1453_v45 = vpop.f32.mrb[1].mxu1 }
 0x36d   : > { %v583_v46 = vpop.f32.mrb[2].mxu1 }
 0x36e   : > { %v1454_v47 = vpop.f32.mrb[3].mxu1  ;;  %v592_v48 = vadd.f32 %v590_v42, %v581_v44 }
 0x370   : > { %v593_v49 = vsel %vm539_vm4, %v592_v48, -inf }
 0x371   : > { %594 = vmax.xlane.f32.xlu1 %v593_v49 }
 0x373   : > { %v704_v51 = vpop.f32.mrb[4].mxu1 }
 0x374   : > { %v705_v52 = vadd.f32 %v704_v51, %v659_v50  ;;  %v1465_v53 = vpop.f32.mrb[5].mxu1 }
 0x375   : > { %v707_v54 = vpop.f32.mrb[6].mxu1 }
 0x376   : > { %v1466_v55 = vpop.f32.mrb[7].mxu1  ;;  %v710_v56 = vadd.f32 %v705_v52, %v590_v42 }
 0x378   : > { %v711_v57 = vsel %vm539_vm4, %v710_v56, -inf }
 0x379   : > { %712 = vmax.xlane.f32.xlu0 %v711_v57 }
 0x37b   : > { %v828_v59 = vpop.f32.mrb[8].mxu1 }
 0x37c   : > { %v829_v60 = vadd.f32 %v828_v59, %v783_v58  ;;  %v1477_v61 = vpop.f32.mrb[9].mxu1 }
 0x37d   : > { %v831_v62 = vpop.f32.mrb[10].mxu1 }
 0x37e   : > { %v1478_v63 = vpop.f32.mrb[11].mxu1  ;;  %v834_v1 = vadd.f32 %v829_v60, %v590_v42 }
 0x380   : > { %v835_v2 = vsel %vm539_vm4, %v834_v1, -inf }
 0x381   : > { %836 = vmax.xlane.f32.xlu0 %v835_v2 }
 0x383   : > { %v952_v5 = vpop.f32.mrb[12].mxu1 }
 0x384   : > { %v953_v6 = vadd.f32 %v952_v5, %v907_v3  ;;  %v1489_v7 = vpop.f32.mrb[13].mxu1  ;;  %v1620_v5 = vld [vmem:[#allocation8] sm:$0xff]  }
 0x385   : > { %v955_v8 = vpop.f32.mrb[14].mxu1  ;;  %1498 = vmatpush3.bf16.msra.mxu1 %v1620_v5 }
 0x386   : > { %v1490_v9 = vpop.f32.mrb[15].mxu1  ;;  %v958_v10 = vadd.f32 %v953_v6, %v590_v42  ;;  %1499 = vmatprep.subr.bf16.mxu1 %v1932_v4 }
 0x387   : > { %v1621_v9 = vld [vmem:[#allocation8 + $0x8] sm:$0xff]  }
 0x388   : > { %v959_v11 = vsel %vm539_vm4, %v958_v10, -inf }
 0x389   : > { %960 = vmax.xlane.f32.xlu1 %v959_v11  ;;  %1500 = vmatpush3.bf16.msra.mxu1 %v1621_v9 }
 0x3fe   : > { %v595_v12 = vpop.xlane.xlu1 %594 }
 0x3ff   : > { %v596_v13 = vsub.f32 %v592_v48, %v595_v12 }
 0x401   : > { %v597_v14 = vmul.f32 1.442695, %v596_v13 }
 0x403   : > { %1626 = vpow2.f32 %v597_v14 }
 0x406   : > { %v713_v15 = vpop.xlane.xlu0 %712 }
 0x407   : > { %v714_v16 = vsub.f32 %v710_v56, %v713_v15 }
 0x409   : > { %v715_v17 = vmul.f32 1.442695, %v714_v16 }
 0x40b   : > { %1628 = vpow2.f32 %v715_v17 }
 0x40d   : > { %v1627_v18 = vpop.eup %1626 }
 0x40e   : > { %v837_v19 = vpop.xlane.xlu0 %836  ;;  %v599_v21 = vsel %vm539_vm4, %v1627_v18, 0.0 }
 0x40f   : > { %v838_v22 = vsub.f32 %v834_v1, %v837_v19  ;;  %600 = vadd.xlane.f32.xlu0 %v599_v21 }
 0x411   : > { %v839_v23 = vmul.f32 1.442695, %v838_v22 }
 0x413   : > { %1630 = vpow2.f32 %v839_v23 }
 0x415   : > { %v1629_v24 = vpop.eup %1628 }
 0x416   : > { %v717_v25 = vsel %vm539_vm4, %v1629_v24, 0.0  ;;  %v961_v28 = vpop.xlane.xlu1 %960 }
 0x417   : > { %718 = vadd.xlane.f32.xlu1 %v717_v25  ;;  %v962_v29 = vsub.f32 %v958_v10, %v961_v28 }
 0x419   : > { %v963_v30 = vmul.f32 1.442695, %v962_v29 }
 0x41b   : > { %1632 = vpow2.f32 %v963_v30 }
 0x41d   : > { %v1631_v26 = vpop.eup %1630 }
 0x41e   : > { %v841_v27 = vsel %vm539_vm4, %v1631_v26, 0.0 }
 0x41f   : > { %842 = vadd.xlane.f32.xlu0 %v841_v27 }
 0x425   : > { %v1633_v31 = vpop.eup %1632 }
 0x426   : > { %v965_v32 = vsel %vm539_vm4, %v1633_v31, 0.0 }
 0x428   : > { %725 = vrot.lane.b32.xlu1 %v2233_v20, %s1941_s15  ;;  %s1418_s15 = sshll.u32 %s2024_s13, 8 }
 0x429   : > { %s2329_s26 = scalar_lea.hbm %s2467_s7, %s1418_s15 }
 0x435   : > { %607 = vrot.lane.b32.xlu0 %v2233_v20, %s2478_s17 }
 0x439   : > { %973 = vrot.lane.b32.xlu0 %v2233_v20, %s1943_s25 }
 0x44c   : > { %966 = vadd.xlane.f32.xlu1 %v965_v32 }
 0x45d   : > { %849 = vrot.lane.b32.xlu1 %v2233_v20, %s1944_s18 }
 0x49c   : > { %v601_v33 = vpop.xlane.xlu0 %600 }
 0x49d   : > { %1634 = vrcp.f32 %v601_v33 }
 0x4a4   : > { %v719_v34 = vpop.xlane.xlu1 %718 }
 0x4a5   : > { %1636 = vrcp.f32 %v719_v34 }
 0x4a7   : > { %v1635_v35 = vpop.eup %1634 }
 0x4a8   : > { %v603_v36 = vmul.f32 %v1635_v35, %v1627_v18  ;;  %v726_v43 = vpop.permute.xlu1 %725 }
 0x4a9   : > { %v731_v45 = vsel %vm612_vm6, %v726_v43, 0 }
 0x4aa   : > { %v604_v37 = vpack.c.bf16 %v603_v36, %v603_v36 }
 0x4ac   : > { %v843_v38 = vpop.xlane.xlu0 %842  ;;  %606 = vst.msk [vmem:[%s2283_s21] sm:$0xf] %vm605_vm5, %v604_v37 }
 0x4ad   : > { %1638 = vrcp.f32 %v843_v38 }
 0x4af   : > { %v1637_v39 = vpop.eup %1636 }
 0x4b0   : > { %v721_v40 = vmul.f32 %v1637_v39, %v1629_v24  ;;  %v608_v41 = vpop.permute.xlu0 %607 }
 0x4b1   : > { %v614_v42 = vsel %vm612_vm6, %v608_v41, 0 }
 0x4b2   : > { %1456 = vmatpush3.bf16.msra.mxu0 %v614_v42  ;;  %v722_v44 = vpack.c.bf16 %v721_v40, %v721_v40 }
 0x4b3   : > { %1467 = vmatprep.subr.bf16.mxu0 %v1932_v4 }
 0x4b4   : > { %1389 = vst.msk [vmem:[%s2283_s21 + $0x4] sm:$0xf] %vm605_vm5, %v722_v44  ;;  %v974_v52 = vpop.permute.xlu0 %973 }
 0x4b5   : > { %1458 = vmatmul.mubr.msk.bf16.vlgmr.msra.gmra.mrb[4].mxu0 %vm539_vm4, %v604_v37  ;;  %v979_v53 = vsel %vm612_vm6, %v974_v52, 0 }
 0x4b6   : > { %1468 = vmatpush3.bf16.msra.mxu0 %v731_v45  ;;  %1469 = vmatprep.mubr.msk.bf16.mxu0 %vm1933_vm1, %v1932_v4 }
 0x4b7   : > { %v1639_v46 = vpop.eup %1638  ;;  %1479 = vmatprep.subr.bf16.mxu0 %v1932_v4 }
 0x4b8   : > { %v845_v47 = vmul.f32 %v1639_v46, %v1631_v26 }
 0x4ba   : > { %v846_v48 = vpack.c.bf16 %v845_v47, %v845_v47 }
 0x4bc   : > { %1393 = vst.msk [vmem:[%s2283_s21 + $0x8] sm:$0xf] %vm605_vm5, %v846_v48 }
 0x4bd   : > { %1470 = vmatmul.mubr.msk.bf16.vlgmr.msra.gmra.mrb[8].mxu0 %vm539_vm4, %v722_v44 }
 0x4be   : > { %1481 = vmatprep.mubr.msk.bf16.mxu0 %vm1933_vm1, %v1932_v4 }
 0x4d9   : > { %v967_v49 = vpop.xlane.xlu1 %966 }
 0x4da   : > { %1640 = vrcp.f32 %v967_v49 }
 0x4dd   : > { %v850_v50 = vpop.permute.xlu1 %849 }
 0x4de   : > { %v855_v51 = vsel %vm612_vm6, %v850_v50, 0 }
 0x4df   : > { %1480 = vmatpush3.bf16.msra.mxu0 %v855_v51 }
 0x4e0   : > { %1491 = vmatprep.subr.bf16.mxu0 %v1932_v4 }
 0x4e2   : > { %1482 = vmatmul.mubr.msk.bf16.vlgmr.msra.gmra.mrb[12].mxu0 %vm539_vm4, %v846_v48 }
 0x4e3   : > { %1492 = vmatpush3.bf16.msra.mxu0 %v979_v53  ;;  %1493 = vmatprep.mubr.msk.bf16.mxu0 %vm1933_vm1, %v1932_v4 }
 0x4e4   : > { %v1641_v54 = vpop.eup %1640 }
 0x4e5   : > { %v969_v55 = vmul.f32 %v1641_v54, %v1633_v31 }
 0x4e7   : > { %v970_v56 = vpack.c.bf16 %v969_v55, %v969_v55 }
 0x4e9   : > { %1397 = vst.msk [vmem:[%s2283_s21 + $0xc] sm:$0xf] %vm605_vm5, %v970_v56 }
 0x4ea   : > { %1494 = vmatmul.mubr.msk.bf16.vlgmr.msra.gmra.mrb[16].mxu0 %vm539_vm4, %v970_v56 }
 0x588   : > { %v650_v57 = vpop.f32.mrb[4].mxu0 }
 0x589   : > { %v656_v58 = vpack.c.bf16 %v650_v57, %v650_v57  ;;  %v1459_v59 = vpop.f32.mrb[5].mxu0 }
 0x58a   : > { %v653_v60 = vpop.f32.mrb[6].mxu0 }
 0x58b   : > { %657 = vst.msk [vmem:[#allocation2] sm:$0xf] %vm605_vm5, %v656_v58  ;;  %v1460_v61 = vpop.f32.mrb[7].mxu0 }
 0x590   : > { %v767_v62 = vpop.f32.mrb[8].mxu0 }
 0x591   : > { %v1415_v63 = vpack.c.bf16 %v767_v62, %v767_v62  ;;  %v1471_v1 = vpop.f32.mrb[9].mxu0 }
 0x592   : > { %v770_v2 = vpop.f32.mrb[10].mxu0 }
 0x593   : > { %777 = vrot.lane.b32.xlu1 %v1415_v63, %s1945_s20  ;;  %v1472_v3 = vpop.f32.mrb[11].mxu0  ;;  %s1134_s20 = sshll.u32 %s2283_s21, 4  ;;  %s2332_s20 = int_to_ptr.vmem [resolvable:$true] %s1134_s20 }
 0x5b5   : > { %v891_v6 = vpop.f32.mrb[12].mxu0 }
 0x5b6   : > { %v1416_v7 = vpack.c.bf16 %v891_v6, %v891_v6  ;;  %v1483_v8 = vpop.f32.mrb[13].mxu0 }
 0x5b7   : > { %v894_v10 = vpop.f32.mrb[14].mxu0 }
 0x5b8   : > { %901 = vrot.lane.b32.xlu0 %v1416_v7, %s1946_s23  ;;  %v1484_v11 = vpop.f32.mrb[15].mxu0  ;;  %s2334_s23 = scalar_lea.sflag [#allocation13], %s1097_s24 }
 0x5bc   : > { %524 = vrot.lane.b32.xlu0 %v2233_v20, %s1935_s22  ;;  %s2317_s22 = scalar_lea.vmem [#allocation14], %s1379_s30  ;;  %s1948_s30 = smov [#allocation12]  }
 0x5bd   : > { %v1015_v12 = vpop.f32.mrb[16].mxu0  ;;  %s1760_s14 = sshll.u32 %s1948_s30, 4  ;;  %s1761_s14 = int_to_ptr.vmem [resolvable:$false] %s1760_s14 }
 0x5be   : > { %v1417_v13 = vpack.c.bf16 %v1015_v12, %v1015_v12  ;;  %v1495_v14 = vpop.f32.mrb[17].mxu0  ;;  %p1763_p2 = scmp.lt.s32.totalorder %s2332_s20, %s1761_s14 }
 0x5bf   : > { %v1018_v15 = vpop.f32.mrb[18].mxu0 }
 0x5c0   : > { %1025 = vrot.lane.b32.xlu1 %v1417_v13, %s1947_s19  ;;  %v1496_v16 = vpop.f32.mrb[19].mxu0  ;;  %s1756_s19 = scalar_lea.vmem %s2332_s20, 256 }
 0x5c1   : > { %p1757_p3 = scmp.ne.s32.totalorder %s2332_s20, %s1756_s19 }
 0x5c3   : > { %p1758_p7 = pnand %p1757_p3, %p2150_p5 }
 0x5c4   : > { %529 = vrot.lane.b32.xlu1 %v2233_v20, %s2478_s17  ;;  %s1762_s17 = scalar_lea.vmem %s1761_s14, 512 }
 0x5c5   : > { %p1759_p12 = pneg %p1758_p7  ;;  %p1764_p1 = scmp.lt.s32.totalorder %s1762_s17, %s1756_s19 }
 0x5c7   : > { %p1765_p4 = por %p1764_p1, %p1763_p2 }
 0x5c9   : > { %p1766_p0 = pnand %p1765_p4, %p1759_p12 }
 0x605   : > { %v778_v4 = vpop.permute.xlu1 %777 }
 0x606   : > { %781 = vst.msk [vmem:[#allocation2] sm:$0xf] %vm780_vm7, %v778_v4 }
 0x62a   : > { %v902_v17 = vpop.permute.xlu0 %901 }
 0x62b   : > { %905 = vst.msk [vmem:[#allocation2] sm:$0xf] %vm904_vm8, %v902_v17 }
 0x62e   : > { %v525_v18 = vpop.permute.xlu0 %524 }
 0x62f   : > { %528 = vst.msk [vmem:[%s2317_s22] sm:$0xf] %vm527_vm9, %v525_v18 }
 0x632   : > { %v1026_v19 = vpop.permute.xlu1 %1025 }
 0x633   : > { %1029 = vst.msk [vmem:[#allocation2] sm:$0xf] %vm1028_vm10, %v1026_v19 }
 0x636   : > { %v530_v20 = vpop.permute.xlu1 %529 }
 0x637   : > { %532 = vst.msk [vmem:[%s2320_s29] sm:$0xf] %vm527_vm9, %v530_v20 }
 0x63a   : > { %v1030_v21 = vld [vmem:[#allocation2] sm:$0xf] }
 0x63b   : > { %1502 = vmatmul.mubr.msk.bf16.vlgmr.msra.gmra.mrb[16].mxu1 %vm437_vm0, %v1030_v21 }
 0x63c   : > { %1769 = shalt.err (!%p1766_p0)
}
 0x63d   : > { %s1770_s21 = scalar_lea.hbm %s2329_s26, 256  ;;  %s1774_s25 = scalar_lea.hbm %s2467_s7, 512 }
 0x63e   : > { %p1771_p9 = scmp.ne.s32.totalorder %s2329_s26, %s1770_s21  ;;  %p1775_p13 = scmp.lt.u32.totalorder %s2329_s26, %s2467_s7 }
 0x63f   : > { %p1776_p6 = scmp.lt.u32.totalorder %s1774_s25, %s1770_s21  ;;  %p1778_p3 = scmp.lt.u32.totalorder %s1770_s21, %s2329_s26 }
 0x640   : > { %p1772_p11 = pnand %p1771_p9, %p2150_p5 }
 0x641   : > { %p1777_p10 = por %p1776_p6, %p1775_p13 }
 0x642   : > { %p1773_p8 = pneg %p1772_p11 }
 0x643   : > { %p1779_p7 = por %p1778_p3, %p1777_p10 }
 0x645   : > { %p1780_p12 = pnand %p1779_p7, %p1773_p8 }
 0x647   : > { %1783 = shalt.err (!%p1780_p12)
}
 0x648   : > { %s1949_s17 = smov 4   ;;  %s2500_s19 = smov 64  }
 0x649   : > { %1520 = dma.vmem_to_hbm [thread:$0]  (%p2150_p5), %s2332_s20, 256, %s2329_s26, %s2334_s23, %s2500_s19, %s2500_s19, %s1949_s17  }
 0x64a   : > { %s1150_s30 = sshll.u32 %s2317_s22, 4  ;;  %s1410_s24 = sshll.u32 %s2024_s13, 6  ;;  %s1151_s30 = int_to_ptr.vmem [resolvable:$true] %s1150_s30 }
 0x64b   : > { %s1148_s25 = scalar_lea.hbm %s2468_s8, %s1410_s24  ;;  %s1784_s18 = scalar_lea.vmem %s1151_s30, 64 }
 0x64c   : > { %p1785_p2 = scmp.ne.s32.totalorder %s1151_s30, %s1784_s18  ;;  %s1950_s14 = smov [#allocation14]  }
 0x64d   : > { %s1788_s0 = sshll.u32 %s1950_s14, 4  ;;  %s1789_s0 = int_to_ptr.vmem [resolvable:$false] %s1788_s0 }
 0x64e   : > { %p1786_p1 = pnand %p1785_p2, %p2150_p5  ;;  %s1790_s1 = scalar_lea.vmem %s1789_s0, 128 }
 0x64f   : > { %p1791_p0 = scmp.lt.s32.totalorder %s1151_s30, %s1789_s0  ;;  %p1792_p9 = scmp.lt.s32.totalorder %s1790_s1, %s1784_s18 }
 0x650   : > { %p1787_p4 = pneg %p1786_p1 }
 0x651   : > { %p1793_p11 = por %p1792_p9, %p1791_p0 }
 0x653   : > { %p1794_p8 = pnand %p1793_p11, %p1787_p4 }
 0x655   : > { %1797 = shalt.err (!%p1794_p8)
}
 0x656   : > { %s1798_s22 = scalar_lea.hbm %s1148_s25, 64  ;;  %s1802_s17 = scalar_lea.hbm %s2468_s8, 128 }
 0x657   : > { %p1799_p13 = scmp.ne.s32.totalorder %s1148_s25, %s1798_s22  ;;  %p1803_p3 = scmp.lt.u32.totalorder %s1148_s25, %s2468_s8 }
 0x658   : > { %p1804_p7 = scmp.lt.u32.totalorder %s1802_s17, %s1798_s22  ;;  %p1806_p2 = scmp.lt.u32.totalorder %s1798_s22, %s1148_s25 }
 0x659   : > { %p1800_p6 = pnand %p1799_p13, %p2150_p5 }
 0x65a   : > { %p1805_p12 = por %p1804_p7, %p1803_p3 }
 0x65b   : > { %p1801_p10 = pneg %p1800_p6 }
 0x65c   : > { %p1807_p1 = por %p1806_p2, %p1805_p12 }
 0x65e   : > { %p1808_p4 = pnand %p1807_p1, %p1801_p10 }
 0x660   : > { %1811 = shalt.err (!%p1808_p4)
}
 0x661   : > { %1521 = dma.vmem_to_hbm [thread:$0]  (%p2150_p5), %s1151_s30, 64, %s1148_s25, %s2334_s23  }
 0x662   : > { %s2385_s15 = scalar_lea.hbm %s2469_s9, %s1410_s24  ;;  %s1163_s18 = sshll.u32 %s2320_s29, 4  ;;  %s1164_s18 = int_to_ptr.vmem [resolvable:$true] %s1163_s18 }
 0x663   : > { %s1108_s14 = scalar_lea.sflag [#allocation16], %s2195_s27  ;;  %s1812_s22 = scalar_lea.vmem %s1164_s18, 64 }
 0x664   : > { %p1813_p0 = scmp.ne.s32.totalorder %s1164_s18, %s1812_s22  ;;  %s1951_s26 = smov [#allocation15]  }
 0x665   : > { %s1816_s20 = sshll.u32 %s1951_s26, 4  ;;  %s1817_s20 = int_to_ptr.vmem [resolvable:$false] %s1816_s20 }
 0x666   : > { %p1814_p9 = pnand %p1813_p0, %p2150_p5  ;;  %s1818_s17 = scalar_lea.vmem %s1817_s20, 128 }
 0x667   : > { %p1819_p8 = scmp.lt.s32.totalorder %s1164_s18, %s1817_s20  ;;  %p1820_p13 = scmp.lt.s32.totalorder %s1818_s17, %s1812_s22 }
 0x668   : > { %p1815_p11 = pneg %p1814_p9 }
 0x669   : > { %p1821_p6 = por %p1820_p13, %p1819_p8 }
 0x66b   : > { %p1822_p10 = pnand %p1821_p6, %p1815_p11 }
 0x66d   : > { %1825 = shalt.err (!%p1822_p10)
}
 0x66e   : > { %s1826_s29 = scalar_lea.hbm %s2385_s15, 64  ;;  %s1830_s24 = scalar_lea.hbm %s2469_s9, 128 }
 0x66f   : > { %p1827_p3 = scmp.ne.s32.totalorder %s2385_s15, %s1826_s29  ;;  %p1831_p2 = scmp.lt.u32.totalorder %s2385_s15, %s2469_s9 }
 0x670   : > { %p1832_p1 = scmp.lt.u32.totalorder %s1830_s24, %s1826_s29  ;;  %p1834_p0 = scmp.lt.u32.totalorder %s1826_s29, %s2385_s15 }
 0x671   : > { %p1828_p7 = pnand %p1827_p3, %p2150_p5 }
 0x672   : > { %p1833_p4 = por %p1832_p1, %p1831_p2 }
 0x673   : > { %p1829_p12 = pneg %p1828_p7 }
 0x674   : > { %p1835_p9 = por %p1834_p0, %p1833_p4 }
 0x676   : > { %p1836_p11 = pnand %p1835_p9, %p1829_p12 }
 0x678   : > { %1839 = shalt.err (!%p1836_p11)
}
 0x679   : > { %1522 = dma.vmem_to_hbm [thread:$0]  (%p2150_p5), %s1164_s18, 64, %s2385_s15, %s1108_s14  }
 0x67a   : > { %s1407_s21 = sshll.u32 %s2024_s13, 7  ;;  %s2501_s0 = sshll.u32 %s2195_s27, 3 }
 0x67b   : > { %s409_s1 = scalar_lea.vmem [#allocation11], %s2501_s0  ;;  %s2502_s17 = sld [smem:[#allocation27_spill]] }
 0x67c   : > { %s1121_s22 = sshll.u32 %s409_s1, 4  ;;  %s1093_s13 = scalar_lea.sflag [#allocation5], %s2195_s27  ;;  %s2415_s22 = int_to_ptr.vmem [resolvable:$true] %s1121_s22 }
 0x67d   : > { %s1840_s15 = scalar_lea.vmem %s2415_s22, 128  ;;  %s1952_s18 = smov [#allocation11]  }
 0x67e   : > { %p1841_p8 = scmp.ne.s32.totalorder %s2415_s22, %s1840_s15  ;;  %s1844_s14 = sshll.u32 %s1952_s18, 4  ;;  %s1845_s14 = int_to_ptr.vmem [resolvable:$false] %s1844_s14 }
 0x67f   : > { %s1846_s23 = scalar_lea.vmem %s1845_s14, 256  ;;  %p1847_p10 = scmp.lt.s32.totalorder %s2415_s22, %s1845_s14 }
 0x680   : > { %p1842_p13 = pnand %p1841_p8, %p2150_p5  ;;  %p1848_p3 = scmp.lt.s32.totalorder %s1846_s23, %s1840_s15 }
 0x681   : > { %s2413_s29 = scalar_lea.hbm %s2502_s17, %s1407_s21 }
 0x682   : > { %p1843_p6 = pneg %p1842_p13  ;;  %p1849_p7 = por %p1848_p3, %p1847_p10 }
 0x684   : > { %p1850_p12 = pnand %p1849_p7, %p1843_p6 }
 0x70e   : > { %v1084_v22 = vpop.f32.mrb[16].mxu1 }
 0x70f   : > { %v1090_v23 = vadd.f32 %v1084_v22, %v2213_v0  ;;  %v1503_v24 = vpop.f32.mrb[17].mxu1 }
 0x710   : > { %v1087_v25 = vpop.f32.mrb[18].mxu1 }
 0x711   : > { %v1504_v26 = vpop.f32.mrb[19].mxu1  ;;  %1091 = vst.msk [vmem:[%s409_s1] sm:$0xff] %vm437_vm0, %v1090_v23 }
 0x712   : > { %1853 = shalt.err (!%p1850_p12)
}
 0x713   : > { %s1854_s27 = scalar_lea.hbm %s2413_s29, 128  ;;  %s1858_s25 = scalar_lea.hbm %s2502_s17, 256 }
 0x714   : > { %p1855_p2 = scmp.ne.s32.totalorder %s2413_s29, %s1854_s27  ;;  %p1859_p0 = scmp.lt.u32.totalorder %s2413_s29, %s2502_s17 }
 0x715   : > { %p1860_p9 = scmp.lt.u32.totalorder %s1858_s25, %s1854_s27  ;;  %p1862_p8 = scmp.lt.u32.totalorder %s1854_s27, %s2413_s29 }
 0x716   : > { %p1856_p1 = pnand %p1855_p2, %p2150_p5 }
 0x717   : > { %p1861_p11 = por %p1860_p9, %p1859_p0 }
 0x718   : > { %p1857_p4 = pneg %p1856_p1 }
 0x719   : > { %p1863_p13 = por %p1862_p8, %p1861_p11 }
 0x71b   : > { %p1864_p6 = pnand %p1863_p13, %p1857_p4 }
 0x71d   : > { %1867 = shalt.err (!%p1864_p6)
}
 0x71e   : > { %1519 = dma.vmem_to_hbm [thread:$0]  (%p2150_p5), %s2415_s22, 128, %s2413_s29, %s1093_s13  }
 0x71f PF: > { %s2503_s0 = sld [smem:[#allocation23_spill]]  ;;  %s2504_s1 = sld [smem:[#allocation24_spill]] }
 0x720   : > { %p2506_p3 = scmp.ge.s32.totalorder %s1922_s12, 2 }
 0x725   : > { %s1175_s26 = sand.u32 1, %s2503_s0   ;;  %p2505_p10 = scmp.ne.s32.totalorder %s2504_s1, 0 }
 0x726   : > { %s1176_s20 = scalar_lea.sflag [#allocation5], %s1175_s26 }
 0x727   : > { %p1542_p7 = pnand %p2506_p3, %p2505_p10 }
 0x729   : > { %1897 = dma.done.wait (!%p1542_p7), %s1176_s20, 128  }
 0x72a   : > { %1899 = vsyncadd (!%p1542_p7), %s1176_s20, 4294967168  ;;  %s2507_s15 = sadd.s32 4294967294, %s1922_s12  }
 0x72b   : > { %s1184_s18 = sand.u32 1, %s2507_s15  }
 0x72c   : > { %s1185_s14 = scalar_lea.sflag [#allocation13], %s1184_s18 }
 0x72d   : > { %1901 = dma.done.wait (!%p1542_p7), %s1185_s14, 320  }
 0x72e   : > { %1903 = vsyncadd (!%p1542_p7), %s1185_s14, 4294966976  ;;  %s1203_s28 = scalar_lea.sflag [#allocation16], %s1175_s26 }
 0x72f   : > { %1905 = dma.done.wait (!%p1542_p7), %s1203_s28, 64  }
 0x730   : > { %1907 = vsyncadd (!%p1542_p7), %s1203_s28, 4294967232  ;;  %p31_p5 = scmp.ge.s32.totalorder %s2136_s6, 4   ;;  %s2508_s30 = smov %s1914_s10 }
 0x731   : > { %s2509_s10 = smov %s1918_s11  ;;  %s2510_s11 = smov %s2146_s16 }
 0x732   : > { %s2511_s12 = smov %s2136_s6  ;;  %33 = sbr.rel (!%p31_p5) target bundleno = 15 (0xf), region = 159 }
 0x739   :  { %1208 = vsyncpa [#allocation4], 1 }
 0x73a   :  { %1210 = vsyncpa [#allocation4 + $0x1], 1 }
 0x73b   :  { %1211 = vsyncpa [#allocation7], 1 }
 0x73c   :  { %1212 = vsyncpa [#allocation10], 1 }
 0x73d   :  { %1213 = vsyncpa [#allocation5], 1 }
 0x73e   :  { %1215 = vsyncpa [#allocation5 + $0x1], 1 }
 0x73f   :  { %1216 = vsyncpa [#allocation13], 1 }
 0x740   :  { %1218 = vsyncpa [#allocation13 + $0x1], 1 }
 0x741   :  { %1219 = vsyncpa [#allocation16], 1 }
 0x742   :  { %1221 = vsyncpa [#allocation16 + $0x1], 1 }

</bundles_post_ra>
